<compile_context>
chip_gen: v7x
topology: tpu7x:2x2x1
jax: 0.10.0
libtpu: 0.0.40
codegen_flags: <defaults>
</compile_context>

<pallas_src>
import functools

import numpy as np
import jax
import jax.numpy as jnp
from jax import lax
from jax.experimental import pallas as pl
from jax.experimental.pallas import tpu as pltpu

LEAKY_SLOPE = 0.01   # torch.nn.LeakyReLU default


def _round_up(v, mult):
    return -(-v // mult) * mult


# --------------------------------------------------------------------------
# Pallas kernel: whole MessageLayer forward (all heads) in one invocation.
# --------------------------------------------------------------------------
def _message_layer_kernel(
    # ---- SMEM (scalar) inputs ----
    cnt_ref,      # (N,)  int32  neighbours (edges) per node
    nstart_ref,   # (N,)  int32  first neighbour node of each node's run
    # ---- VMEM inputs ----
    w_ref,        # (Np, 1)      fractional element weights (padded with 1)
    x_ref,        # (Np, F)      element features (zero padded)
    w1_ref,       # (F, 2*HK)    fused hidden weights  [self half | nbr half]
    b1_ref,       # (1, HK)      fused hidden bias
    wg2_ref,      # (HK, H)      gate output weights (zeros on msg lanes)
    bg2_ref,      # (1, H)
    wm2c_ref,     # (H*Gm, F)    message output weights, heads stacked on rows
    bm2c_ref,     # (H, F)       message output bias, one row per head
    pow_ref,      # (1, H)       per-head attention "pow" parameter
    # ---- output ----
    out_ref,      # (Np, F)
    # ---- VMEM scratch (all node granularity) ----
    hs_ref,       # (Np, HK)     self-half hidden pre-activation (+ bias)
    hn_ref,       # (Np, HK)     neighbour-half hidden pre-activation
    logw_ref,     # (Np, 1)      log(element weights)
    pooled_ref,   # (Np, H*Gm)   attention-pooled m1 per head
    satt_ref,     # (Np, H)      sum of normalised attention per head
    *, n_nodes, lp, num_heads, gate_dim, msg_dim,
):
    k = gate_dim + msg_dim
    hk = num_heads * k

    # -- phase A: node-granularity precompute (one lane-dense matmul) -------
    # log(w) with clamp (reference computes w**pow; clamp avoids -inf*0 NaN).
    logw_ref[...] = jnp.log(jnp.maximum(w_ref[...], jnp.float32(1e-30)))
    hid = jnp.dot(x_ref[...], w1_ref[...],
                  preferred_element_type=jnp.float32)          # (Np, 2*HK)
    hs_ref[...] = hid[:, :hk] + b1_ref[...]
    hn_ref[...] = hid[:, hk:]

    pooled_ref[...] = jnp.zeros_like(pooled_ref)
    satt_ref[...] = jnp.zeros_like(satt_ref)

    # hoisted loop invariants
    row_ids = lax.broadcasted_iota(jnp.int32, (lp, 1), 0)
    pw = pow_ref[...]                         # (1, H)
    wg2 = wg2_ref[...]                        # (HK, H)
    bg2 = bg2_ref[...]                        # (1, H)

    # -- phase B: per-node segment softmax + attention pooling --------------
    @pl.loop(0, n_nodes)
    def _(node):
        cnt = cnt_ref[node]
        ns = nstart_ref[node]
        # contiguous neighbour run -> full-width slab load, no per-edge gather
        pre = hs_ref[pl.ds(node, 1), :] + hn_ref[pl.ds(ns, lp), :]      # (lp, HK)
        h1 = jnp.where(pre >= 0, pre, LEAKY_SLOPE * pre)
        gate = jnp.dot(h1, wg2, preferred_element_type=jnp.float32) + bg2  # (lp, H)
        lw = logw_ref[pl.ds(ns, lp), :]                                 # (lp, 1)
        valid = row_ids < cnt

        gmax = jnp.max(jnp.where(valid, gate, jnp.float32(-1e30)),
                       axis=0, keepdims=True)                           # (1, H)
        # fused: (w ** pow) * exp(gate - max) == exp(pow*log(w) + gate - max)
        att = jnp.where(valid, jnp.exp(pw * lw + (gate - gmax)), jnp.float32(0.0))
        s = jnp.sum(att, axis=0, keepdims=True)                         # (1, H)
        denom = s + jnp.float32(1e-10)
        r = pl.reciprocal(denom, approx=True)
        r = r * (jnp.float32(2.0) - denom * r)      # one Newton step -> f32 accurate
        att = att * r                                                   # (lp, H)

        parts = []
        for head in range(num_heads):               # heads: small, static
            m1_h = h1[:, head * k + gate_dim:(head + 1) * k]            # (lp, Gm)
            parts.append(jnp.sum(att[:, head:head + 1] * m1_h,
                                 axis=0, keepdims=True))                # (1, Gm)
        pooled_ref[pl.ds(node, 1), :] = jnp.concatenate(parts, axis=1)  # (1, H*Gm)
        satt_ref[pl.ds(node, 1), :] = s * r                             # (1, H)

    # -- phase C: project pooled m1, head mean, residual (lane-dense) -------
    msg = jnp.dot(pooled_ref[...], wm2c_ref[...],
                  preferred_element_type=jnp.float32)                   # (Np, F)
    msg = msg + jnp.dot(satt_ref[...], bm2c_ref[...],
                        preferred_element_type=jnp.float32)
    out_ref[...] = msg * jnp.float32(1.0 / num_heads) + x_ref[...]


# --------------------------------------------------------------------------
# Wrapper
# --------------------------------------------------------------------------
def message_layer_pallas(elem_weights, elem_in_fea, self_fea_idx, nbr_fea_idx, params):
    n, f = elem_in_fea.shape
    m = int(self_fea_idx.shape[0])
    h = int(params["wg1"].shape[0])
    g = int(params["wg1"].shape[2])
    gm = int(params["wm1"].shape[2])
    k = g + gm
    hk = h * k

    # --- static segment metadata (roost: sorted self_idx, all-pairs runs) ---
    sidx = np.asarray(self_fea_idx, dtype=np.int64).reshape(-1)
    nidx = np.asarray(nbr_fea_idx, dtype=np.int64).reshape(-1)
    assert np.all(np.diff(sidx) >= 0), "self_fea_idx must be sorted per node"
    counts = np.bincount(sidx, minlength=n).astype(np.int64)
    off = np.zeros(n + 1, dtype=np.int64)
    off[1:] = np.cumsum(counts)
    nstart = np.zeros(n, dtype=np.int64)
    nonempty = counts > 0
    nstart[nonempty] = nidx[off[:-1][nonempty]]
    pos = np.arange(m, dtype=np.int64) - off[sidx]
    assert np.array_equal(nidx, nstart[sidx] + pos), (
        "nbr_fea_idx must form contiguous ascending runs per node "
        "(roost all-pairs-per-crystal layout)")

    lp = _round_up(max(int(counts.max()), 1), 8)     # max neighbours per node
    np_rows = _round_up(n + lp, 8)                   # pad so ds(nstart, lp) stays in bounds

    # --- pad node arrays (zero features, unit weights -> log w = 0) ---------
    x = jnp.asarray(elem_in_fea, jnp.float32)
    w = jnp.asarray(elem_weights, jnp.float32).reshape(n, 1)
    x_pad = jnp.zeros((np_rows, f), jnp.float32).at[:n, :].set(x)
    w_pad = jnp.ones((np_rows, 1), jnp.float32).at[:n, :].set(w)

    # --- weight repacking (layout only) --------------------------------------
    wg1 = np.asarray(params["wg1"], np.float32)   # (H, 2F, G)
    bg1 = np.asarray(params["bg1"], np.float32)   # (H, 1, G)
    wg2 = np.asarray(params["wg2"], np.float32)   # (H, G, 1)
    bg2 = np.asarray(params["bg2"], np.float32)   # (H, 1, 1)
    wm1 = np.asarray(params["wm1"], np.float32)   # (H, 2F, Gm)
    bm1 = np.asarray(params["bm1"], np.float32)   # (H, 1, Gm)
    wm2 = np.asarray(params["wm2"], np.float32)   # (H, Gm, F)
    bm2 = np.asarray(params["bm2"], np.float32)   # (H, 1, F)
    pw = np.asarray(params["pow"], np.float32).reshape(1, h)

    # per-head lane layout of the hidden slab: [gate(G) | msg(Gm)]
    w_self = np.concatenate(
        [np.concatenate([wg1[i, :f], wm1[i, :f]], axis=1) for i in range(h)], axis=1)
    w_nbr = np.concatenate(
        [np.concatenate([wg1[i, f:], wm1[i, f:]], axis=1) for i in range(h)], axis=1)
    w1 = np.concatenate([w_self, w_nbr], axis=1)                    # (F, 2*HK)
    b1 = np.concatenate(
        [np.concatenate([bg1[i], bm1[i]], axis=1) for i in range(h)], axis=1)  # (1, HK)

    wg2p = np.zeros((hk, h), np.float32)
    bg2p = np.zeros((1, h), np.float32)
    for i in range(h):
        wg2p[i * k:i * k + g, i] = wg2[i][:, 0]
        bg2p[0, i] = bg2[i].reshape(())
    wm2c = np.concatenate([wm2[i] for i in range(h)], axis=0)       # (H*Gm, F)
    bm2c = np.concatenate([bm2[i].reshape(1, f) for i in range(h)], axis=0)  # (H, F)

    # --- VMEM budget / cost hints -------------------------------------------
    def _tile_bytes(rows, cols):
        return _round_up(max(rows, 1), 8) * _round_up(max(cols, 1), 128) * 4

    vmem_need = sum(_tile_bytes(*s) for s in [
        (np_rows, 1), (np_rows, f), (f, 2 * hk), (1, hk), (hk, h), (1, h),
        (h * gm, f), (h, f), (1, h),                    # inputs
        (np_rows, f),                                   # output
        (np_rows, hk), (np_rows, hk), (np_rows, 1),     # scratch
        (np_rows, h * gm), (np_rows, h),
    ])
    vmem_limit = int(min(max(2 * vmem_need + (4 << 20), 32 << 20), 64 << 20))

    cost = pl.CostEstimate(
        flops=int(2 * np_rows * f * 2 * hk + 2 * n * lp * hk * h + 6 * n * lp * hk
                  + 2 * np_rows * h * gm * f + 2 * np_rows * h * f),
        transcendentals=int(np_rows + n * lp * h),
        bytes_accessed=int(4 * (np_rows * (2 * f + 2 + hk)
                                + 2 * f * hk + hk * h + h * gm * f + h * f)),
    )

    kernel = functools.partial(_message_layer_kernel, n_nodes=n, lp=lp,
                               num_heads=h, gate_dim=g, msg_dim=gm)
    smem = pl.BlockSpec(memory_space=pltpu.MemorySpace.SMEM)
    vmem = pl.BlockSpec(memory_space=pltpu.MemorySpace.VMEM)

    out = pl.pallas_call(
        kernel,
        out_shape=jax.ShapeDtypeStruct((np_rows, f), jnp.float32),
        in_specs=[smem, smem] + [vmem] * 9,
        out_specs=vmem,
        scratch_shapes=[
            pltpu.VMEM((np_rows, hk), jnp.float32),      # self-half hidden (+bias)
            pltpu.VMEM((np_rows, hk), jnp.float32),      # neighbour-half hidden
            pltpu.VMEM((np_rows, 1), jnp.float32),       # log(w)
            pltpu.VMEM((np_rows, h * gm), jnp.float32),  # pooled m1
            pltpu.VMEM((np_rows, h), jnp.float32),       # sum of attention
        ],
        compiler_params=pltpu.CompilerParams(vmem_limit_bytes=vmem_limit),
        cost_estimate=cost,
    )(
        jnp.asarray(counts.astype(np.int32)),
        jnp.asarray(nstart.astype(np.int32)),
        w_pad, x_pad,
        jnp.asarray(w1), jnp.asarray(b1),
        jnp.asarray(wg2p), jnp.asarray(bg2p),
        jnp.asarray(wm2c), jnp.asarray(bm2c),
        jnp.asarray(pw),
    )
    return out[:n]


# --------------------------------------------------------------------------
# Pure-JAX reference (mirrors the PyTorch module semantics)
# --------------------------------------------------------------------------
def message_layer_ref(elem_weights, elem_in_fea, self_idx, nbr_idx, params):
    n = elem_in_fea.shape[0]
    num_heads = params["wg1"].shape[0]
    fea = jnp.concatenate([elem_in_fea[self_idx], elem_in_fea[nbr_idx]], axis=1)
    nbr_w = elem_weights[nbr_idx]
    heads = []
    for h in range(num_heads):
        g1 = jax.nn.leaky_relu(fea @ params["wg1"][h] + params["bg1"][h], LEAKY_SLOPE)
        gate = g1 @ params["wg2"][h] + params["bg2"][h]
        seg_max = jax.ops.segment_max(gate, self_idx, num_segments=n)
        gate = gate - seg_max[self_idx]
        gate = (nbr_w ** params["pow"][h][0, 0]) * jnp.exp(gate)
        seg_sum = jax.ops.segment_sum(gate, self_idx, num_segments=n)
        gate = gate / (seg_sum[self_idx] + 1e-10)
        m1 = jax.nn.leaky_relu(fea @ params["wm1"][h] + params["bm1"][h], LEAKY_SLOPE)
        msg = m1 @ params["wm2"][h] + params["bm2"][h]
        heads.append(jax.ops.segment_sum(gate * msg, self_idx, num_segments=n))
    return jnp.mean(jnp.stack(heads), axis=0) + elem_in_fea


# --------------------------------------------------------------------------
# Deterministic parameter init (shapes per MessageLayer.__init__)
# --------------------------------------------------------------------------
def init_params(key, elem_fea_len, elem_heads, elem_gate, elem_msg):
    f = elem_fea_len
    g = elem_gate[0]   # single hidden layer (typical roost config)
    gm = elem_msg[0]
    ks = jax.random.split(key, 9)

    def lin(k, fan_in, shape):
        return (jax.random.normal(k, shape, jnp.float32) / jnp.sqrt(fan_in)).astype(jnp.float32)

    h = elem_heads
    return {
        "wg1": lin(ks[0], 2 * f, (h, 2 * f, g)),
        "bg1": lin(ks[1], 2 * f, (h, 1, g)),
        "wg2": lin(ks[2], g, (h, g, 1)),
        "bg2": lin(ks[3], g, (h, 1, 1)),
        "wm1": lin(ks[4], 2 * f, (h, 2 * f, gm)),
        "bm1": lin(ks[5], 2 * f, (h, 1, gm)),
        "wm2": lin(ks[6], gm, (h, gm, f)),
        "bm2": lin(ks[7], gm, (h, 1, f)),
        "pow": jax.random.normal(ks[8], (h, 1, 1), jnp.float32),
    }


if __name__ == "__main__":
    key = jax.random.PRNGKey(0)
    k_w, k_x, k_p = jax.random.split(key, 3)

    # Small synthetic stoichiometry batch: 2 crystals with 3 and 5 elements.
    elem_fea_len, elem_heads = 32, 2
    elem_gate, elem_msg = [32], [32]
    crystal_sizes = [3, 5]
    N = sum(crystal_sizes)

    self_list, nbr_list, start = [], [], 0
    for sz in crystal_sizes:
        for i in range(sz):
            for j in range(sz):
                self_list.append(start + i)
                nbr_list.append(start + j)
        start += sz
    self_idx = jnp.array(self_list, dtype=jnp.int32)   # (M,)  sorted (roost layout)
    nbr_idx = jnp.array(nbr_list, dtype=jnp.int32)     # (M,)  all-pairs per crystal

    elem_weights = jax.random.uniform(k_w, (N, 1), jnp.float32, 0.1, 1.0)
    elem_in_fea = jax.random.normal(k_x, (N, elem_fea_len), jnp.float32)
    params = init_params(k_p, elem_fea_len, elem_heads, elem_gate, elem_msg)

    out = message_layer_pallas(elem_weights, elem_in_fea, self_idx, nbr_idx, params)
    out = jax.block_until_ready(out)

    ref = message_layer_ref(elem_weights, elem_in_fea, self_idx, nbr_idx, params)
    assert out.shape == (N, elem_fea_len)
    err = float(jnp.max(jnp.abs(out - ref)))
    assert jnp.allclose(out, ref, rtol=1e-4, atol=1e-5), f"max abs err = {err}"

    print("KERNEL_OK")
</pallas_src>

<mosaic_0001>
module attributes {stable_mosaic.version = 11 : i64} {
  func.func @_message_layer_kernel(%arg0: memref<8xi32, #tpu.memory_space<smem>>, %arg1: memref<8xi32, #tpu.memory_space<smem>>, %arg2: memref<16x1xf32, #tpu.memory_space<vmem>>, %arg3: memref<16x32xf32, #tpu.memory_space<vmem>>, %arg4: memref<32x256xf32, #tpu.memory_space<vmem>>, %arg5: memref<1x128xf32, #tpu.memory_space<vmem>>, %arg6: memref<128x2xf32, #tpu.memory_space<vmem>>, %arg7: memref<1x2xf32, #tpu.memory_space<vmem>>, %arg8: memref<64x32xf32, #tpu.memory_space<vmem>>, %arg9: memref<2x32xf32, #tpu.memory_space<vmem>>, %arg10: memref<1x2xf32, #tpu.memory_space<vmem>>, %arg11: memref<16x32xf32, #tpu.memory_space<vmem>>, %arg12: memref<16x128xf32, #tpu.memory_space<vmem>>, %arg13: memref<16x128xf32, #tpu.memory_space<vmem>>, %arg14: memref<16x1xf32, #tpu.memory_space<vmem>>, %arg15: memref<16x64xf32, #tpu.memory_space<vmem>>, %arg16: memref<16x2xf32, #tpu.memory_space<vmem>>) attributes {dimension_semantics = [], scalar_prefetch = 0 : i64, scratch_operands = 5 : i64, tpu.core_type = #tpu.core_type<tc>} {
    %c0 = arith.constant 0 : index
    %c0_0 = arith.constant 0 : index
    %0 = vector.load %arg2[%c0, %c0_0] : memref<16x1xf32, #tpu.memory_space<vmem>>, vector<16x1xf32>
    %cst = arith.constant 1.000000e-30 : f32
    %1 = vector.broadcast %cst : f32 to vector<16x1xf32>
    %2 = arith.maximumf %0, %1 : vector<16x1xf32>
    %3 = math.log %2 : vector<16x1xf32>
    %c0_1 = arith.constant 0 : index
    %c0_2 = arith.constant 0 : index
    %4 = vector.load %arg14[%c0_1, %c0_2] : memref<16x1xf32, #tpu.memory_space<vmem>>, vector<16x1xf32>
    tpu.vector_store %arg14[%c0_1, %c0_2], %3 {strides = array<i32>} : memref<16x1xf32, #tpu.memory_space<vmem>>, vector<16x1xf32>,
    %c0_3 = arith.constant 0 : index
    %c0_4 = arith.constant 0 : index
    %5 = vector.load %arg3[%c0_3, %c0_4] : memref<16x32xf32, #tpu.memory_space<vmem>>, vector<16x32xf32>
    %c0_5 = arith.constant 0 : index
    %c0_6 = arith.constant 0 : index
    %6 = vector.load %arg4[%c0_5, %c0_6] : memref<32x256xf32, #tpu.memory_space<vmem>>, vector<32x256xf32>
    %cst_7 = arith.constant dense<0.000000e+00> : vector<16x256xf32>
    %7 = tpu.matmul %5, %6, %cst_7 {dimension_numbers = #tpu.dot_dimension_numbers<[1], [0], [0], [1], [0, 0, 1, 1], [], []>} : vector<16x32xf32>, vector<32x256xf32>, vector<16x256xf32> -> vector<16x256xf32>
    %8 = vector.extract_strided_slice %7 {offsets = [0, 0], sizes = [16, 128], strides = [1, 1]} : vector<16x256xf32> to vector<16x128xf32>
    %c0_8 = arith.constant 0 : index
    %c0_9 = arith.constant 0 : index
    %9 = vector.load %arg5[%c0_8, %c0_9] : memref<1x128xf32, #tpu.memory_space<vmem>>, vector<1x128xf32>
    %10 = vector.broadcast %9 : vector<1x128xf32> to vector<16x128xf32>
    %11 = arith.addf %8, %10 : vector<16x128xf32>
    %c0_10 = arith.constant 0 : index
    %c0_11 = arith.constant 0 : index
    %12 = vector.load %arg12[%c0_10, %c0_11] : memref<16x128xf32, #tpu.memory_space<vmem>>, vector<16x128xf32>
    tpu.vector_store %arg12[%c0_10, %c0_11], %11 {strides = array<i32>} : memref<16x128xf32, #tpu.memory_space<vmem>>, vector<16x128xf32>,
    %13 = vector.extract_strided_slice %7 {offsets = [0, 128], sizes = [16, 128], strides = [1, 1]} : vector<16x256xf32> to vector<16x128xf32>
    %c0_12 = arith.constant 0 : index
    %c0_13 = arith.constant 0 : index
    %14 = vector.load %arg13[%c0_12, %c0_13] : memref<16x128xf32, #tpu.memory_space<vmem>>, vector<16x128xf32>
    tpu.vector_store %arg13[%c0_12, %c0_13], %13 {strides = array<i32>} : memref<16x128xf32, #tpu.memory_space<vmem>>, vector<16x128xf32>,
    %cst_14 = arith.constant 0.000000e+00 : f32
    %15 = vector.broadcast %cst_14 : f32 to vector<16x64xf32>
    %c0_15 = arith.constant 0 : index
    %c0_16 = arith.constant 0 : index
    %16 = vector.load %arg15[%c0_15, %c0_16] : memref<16x64xf32, #tpu.memory_space<vmem>>, vector<16x64xf32>
    tpu.vector_store %arg15[%c0_15, %c0_16], %15 {strides = array<i32>} : memref<16x64xf32, #tpu.memory_space<vmem>>, vector<16x64xf32>,
    %cst_17 = arith.constant 0.000000e+00 : f32
    %17 = vector.broadcast %cst_17 : f32 to vector<16x2xf32>
    %c0_18 = arith.constant 0 : index
    %c0_19 = arith.constant 0 : index
    %18 = vector.load %arg16[%c0_18, %c0_19] : memref<16x2xf32, #tpu.memory_space<vmem>>, vector<16x2xf32>
    tpu.vector_store %arg16[%c0_18, %c0_19], %17 {strides = array<i32>} : memref<16x2xf32, #tpu.memory_space<vmem>>, vector<16x2xf32>,
    %19 = tpu.iota {dimensions = array<i32: 0>} : vector<8x1xi32>
    %c0_20 = arith.constant 0 : index
    %c0_21 = arith.constant 0 : index
    %20 = vector.load %arg10[%c0_20, %c0_21] : memref<1x2xf32, #tpu.memory_space<vmem>>, vector<1x2xf32>
    %c0_22 = arith.constant 0 : index
    %c0_23 = arith.constant 0 : index
    %21 = vector.load %arg6[%c0_22, %c0_23] : memref<128x2xf32, #tpu.memory_space<vmem>>, vector<128x2xf32>
    %c0_24 = arith.constant 0 : index
    %c0_25 = arith.constant 0 : index
    %22 = vector.load %arg7[%c0_24, %c0_25] : memref<1x2xf32, #tpu.memory_space<vmem>>, vector<1x2xf32>
    %c0_i32 = arith.constant 0 : i32
    %c8_i32 = arith.constant 8 : i32
    %23 = arith.addi %c0_i32, %c8_i32 : i32
    %c1_i32 = arith.constant 1 : i32
    scf.for %arg17 = %c0_i32 to %23 step %c1_i32  : i32 {
      %c1_i32_42 = arith.constant 1 : i32
      %36 = arith.muli %arg17, %c1_i32_42 : i32
      %c0_i32_43 = arith.constant 0 : i32
      %37 = arith.addi %c0_i32_43, %36 : i32
      %38 = arith.index_cast %37 : i32 to index
      %39 = memref.load %arg0[%38] : memref<8xi32, #tpu.memory_space<smem>>
      %40 = arith.index_cast %37 : i32 to index
      %41 = memref.load %arg1[%40] : memref<8xi32, #tpu.memory_space<smem>>
      %42 = arith.index_cast %37 : i32 to index
      %c0_44 = arith.constant 0 : index
      %43 = vector.load %arg12[%42, %c0_44] : memref<16x128xf32, #tpu.memory_space<vmem>>, vector<1x128xf32>
      %44 = arith.index_cast %41 : i32 to index
      %c0_45 = arith.constant 0 : index
      %45 = vector.load %arg13[%44, %c0_45] : memref<16x128xf32, #tpu.memory_space<vmem>>, vector<8x128xf32>
      %46 = vector.broadcast %43 : vector<1x128xf32> to vector<8x128xf32>
      %47 = arith.addf %46, %45 : vector<8x128xf32>
      %cst_46 = arith.constant 0.000000e+00 : f32
      %48 = vector.broadcast %cst_46 : f32 to vector<8x128xf32>
      %49 = arith.cmpf oge, %47, %48 : vector<8x128xf32>
      %cst_47 = arith.constant 0.00999999977 : f32
      %50 = vector.broadcast %cst_47 : f32 to vector<8x128xf32>
      %51 = arith.mulf %50, %47 : vector<8x128xf32>
      %52 = arith.select %49, %47, %51 : vector<8x128xi1>, vector<8x128xf32>
      %cst_48 = arith.constant dense<0.000000e+00> : vector<8x2xf32>
      %53 = tpu.matmul %52, %21, %cst_48 {dimension_numbers = #tpu.dot_dimension_numbers<[1], [0], [0], [1], [0, 0, 1, 1], [], []>} : vector<8x128xf32>, vector<128x2xf32>, vector<8x2xf32> -> vector<8x2xf32>
      %54 = vector.broadcast %22 : vector<1x2xf32> to vector<8x2xf32>
      %55 = arith.addf %53, %54 : vector<8x2xf32>
      %56 = arith.index_cast %41 : i32 to index
      %c0_49 = arith.constant 0 : index
      %57 = vector.load %arg14[%56, %c0_49] : memref<16x1xf32, #tpu.memory_space<vmem>>, vector<8x1xf32>
      %58 = vector.broadcast %39 : i32 to vector<8x1xi32>
      %59 = arith.cmpi slt, %19, %58 : vector<8x1xi32>
      %cst_50 = arith.constant -1.000000e+30 : f32
      %60 = vector.shape_cast %59 : vector<8x1xi1> to vector<8x1xi1>
      %61 = vector.broadcast %60 : vector<8x1xi1> to vector<8x2xi1>
      %62 = vector.broadcast %cst_50 : f32 to vector<8x2xf32>
      %63 = arith.select %61, %55, %62 : vector<8x2xi1>, vector<8x2xf32>
      %cst_51 = arith.constant dense<0xFF800000> : vector<2xf32>
      %64 = vector.multi_reduction <maximumf>, %63, %cst_51 [0] : vector<8x2xf32> to vector<2xf32>
      %65 = vector.shape_cast %64 : vector<2xf32> to vector<1x2xf32>
      %66 = vector.broadcast %20 : vector<1x2xf32> to vector<8x2xf32>
      %67 = vector.broadcast %57 : vector<8x1xf32> to vector<8x2xf32>
      %68 = arith.mulf %66, %67 : vector<8x2xf32>
      %69 = vector.broadcast %65 : vector<1x2xf32> to vector<8x2xf32>
      %70 = arith.subf %55, %69 : vector<8x2xf32>
      %71 = arith.addf %68, %70 : vector<8x2xf32>
      %72 = math.exp %71 : vector<8x2xf32>
      %cst_52 = arith.constant 0.000000e+00 : f32
      %73 = vector.shape_cast %59 : vector<8x1xi1> to vector<8x1xi1>
      %74 = vector.broadcast %73 : vector<8x1xi1> to vector<8x2xi1>
      %75 = vector.broadcast %cst_52 : f32 to vector<8x2xf32>
      %76 = arith.select %74, %72, %75 : vector<8x2xi1>, vector<8x2xf32>
      %cst_53 = arith.constant dense<0.000000e+00> : vector<2xf32>
      %77 = vector.multi_reduction <add>, %76, %cst_53 [0] : vector<8x2xf32> to vector<2xf32>
      %78 = vector.shape_cast %77 : vector<2xf32> to vector<1x2xf32>
      %cst_54 = arith.constant 1.000000e-10 : f32
      %79 = vector.broadcast %cst_54 : f32 to vector<1x2xf32>
      %80 = arith.addf %78, %79 : vector<1x2xf32>
      %81 = tpu.reciprocal %80 {approx = true} : vector<1x2xf32> -> vector<1x2xf32>
      %82 = arith.mulf %80, %81 : vector<1x2xf32>
      %cst_55 = arith.constant 2.000000e+00 : f32
      %83 = vector.broadcast %cst_55 : f32 to vector<1x2xf32>
      %84 = arith.subf %83, %82 : vector<1x2xf32>
      %85 = arith.mulf %81, %84 : vector<1x2xf32>
      %86 = vector.broadcast %85 : vector<1x2xf32> to vector<8x2xf32>
      %87 = arith.mulf %76, %86 : vector<8x2xf32>
      %88 = vector.extract_strided_slice %52 {offsets = [0, 32], sizes = [8, 32], strides = [1, 1]} : vector<8x128xf32> to vector<8x32xf32>
      %89 = vector.extract_strided_slice %87 {offsets = [0, 0], sizes = [8, 1], strides = [1, 1]} : vector<8x2xf32> to vector<8x1xf32>
      %90 = vector.broadcast %89 : vector<8x1xf32> to vector<8x32xf32>
      %91 = arith.mulf %90, %88 : vector<8x32xf32>
      %cst_56 = arith.constant dense<0.000000e+00> : vector<32xf32>
      %92 = vector.multi_reduction <add>, %91, %cst_56 [0] : vector<8x32xf32> to vector<32xf32>
      %93 = vector.shape_cast %92 : vector<32xf32> to vector<1x32xf32>
      %94 = vector.extract_strided_slice %52 {offsets = [0, 96], sizes = [8, 32], strides = [1, 1]} : vector<8x128xf32> to vector<8x32xf32>
      %95 = vector.extract_strided_slice %87 {offsets = [0, 1], sizes = [8, 1], strides = [1, 1]} : vector<8x2xf32> to vector<8x1xf32>
      %96 = vector.broadcast %95 : vector<8x1xf32> to vector<8x32xf32>
      %97 = arith.mulf %96, %94 : vector<8x32xf32>
      %cst_57 = arith.constant dense<0.000000e+00> : vector<32xf32>
      %98 = vector.multi_reduction <add>, %97, %cst_57 [0] : vector<8x32xf32> to vector<32xf32>
      %99 = vector.shape_cast %98 : vector<32xf32> to vector<1x32xf32>
      %100 = tpu.concatenate %93, %99 in 1 : vector<1x32xf32>, vector<1x32xf32> -> vector<1x64xf32>
      %101 = arith.index_cast %37 : i32 to index
      %c0_58 = arith.constant 0 : index
      %102 = vector.load %arg15[%101, %c0_58] : memref<16x64xf32, #tpu.memory_space<vmem>>, vector<1x64xf32>
      tpu.vector_store %arg15[%101, %c0_58], %100 {strides = array<i32>} : memref<16x64xf32, #tpu.memory_space<vmem>>, vector<1x64xf32>,
      %103 = arith.mulf %78, %85 : vector<1x2xf32>
      %104 = arith.index_cast %37 : i32 to index
      %c0_59 = arith.constant 0 : index
      %105 = vector.load %arg16[%104, %c0_59] : memref<16x2xf32, #tpu.memory_space<vmem>>, vector<1x2xf32>
      tpu.vector_store %arg16[%104, %c0_59], %103 {strides = array<i32>} : memref<16x2xf32, #tpu.memory_space<vmem>>, vector<1x2xf32>,
    }
    %c8_i32_26 = arith.constant 8 : i32
    %c0_27 = arith.constant 0 : index
    %c0_28 = arith.constant 0 : index
    %24 = vector.load %arg15[%c0_27, %c0_28] : memref<16x64xf32, #tpu.memory_space<vmem>>, vector<16x64xf32>
    %c0_29 = arith.constant 0 : index
    %c0_30 = arith.constant 0 : index
    %25 = vector.load %arg8[%c0_29, %c0_30] : memref<64x32xf32, #tpu.memory_space<vmem>>, vector<64x32xf32>
    %cst_31 = arith.constant dense<0.000000e+00> : vector<16x32xf32>
    %26 = tpu.matmul %24, %25, %cst_31 {dimension_numbers = #tpu.dot_dimension_numbers<[1], [0], [0], [1], [0, 0, 1, 1], [], []>} : vector<16x64xf32>, vector<64x32xf32>, vector<16x32xf32> -> vector<16x32xf32>
    %c0_32 = arith.constant 0 : index
    %c0_33 = arith.constant 0 : index
    %27 = vector.load %arg16[%c0_32, %c0_33] : memref<16x2xf32, #tpu.memory_space<vmem>>, vector<16x2xf32>
    %c0_34 = arith.constant 0 : index
    %c0_35 = arith.constant 0 : index
    %28 = vector.load %arg9[%c0_34, %c0_35] : memref<2x32xf32, #tpu.memory_space<vmem>>, vector<2x32xf32>
    %cst_36 = arith.constant dense<0.000000e+00> : vector<16x32xf32>
    %29 = tpu.matmul %27, %28, %cst_36 {dimension_numbers = #tpu.dot_dimension_numbers<[1], [0], [0], [1], [0, 0, 1, 1], [], []>} : vector<16x2xf32>, vector<2x32xf32>, vector<16x32xf32> -> vector<16x32xf32>
    %30 = arith.addf %26, %29 : vector<16x32xf32>
    %cst_37 = arith.constant 5.000000e-01 : f32
    %31 = vector.broadcast %cst_37 : f32 to vector<16x32xf32>
    %32 = arith.mulf %30, %31 : vector<16x32xf32>
    %c0_38 = arith.constant 0 : index
    %c0_39 = arith.constant 0 : index
    %33 = vector.load %arg3[%c0_38, %c0_39] : memref<16x32xf32, #tpu.memory_space<vmem>>, vector<16x32xf32>
    %34 = arith.addf %32, %33 : vector<16x32xf32>
    %c0_40 = arith.constant 0 : index
    %c0_41 = arith.constant 0 : index
    %35 = vector.load %arg11[%c0_40, %c0_41] : memref<16x32xf32, #tpu.memory_space<vmem>>, vector<16x32xf32>
    tpu.vector_store %arg11[%c0_40, %c0_41], %34 {strides = array<i32>} : memref<16x32xf32, #tpu.memory_space<vmem>>, vector<16x32xf32>,
    return
  }
}

</mosaic_0001>

<bundles_post_ra>
// kernel: tpu_custom_call.1
= control target key start
LH: loop header
LB: loop body
LE: loop exit
PB: predicated region body
PF: predicated region fallthrough
CT: control target
= control target key end

     0   :  { %16 = vsyncpa [#allocation9], 0  ;;  %s1162_s0 = inlined_call_operand.vmem [shape: s32[8], index: 0, kind: input, shape index: {}]   ;;  %s1163_s1 = inlined_call_operand.vmem [shape: s32[8], index: 1, kind: input, shape index: {}]   ;;  %s1164_s2 = inlined_call_operand.vmem [shape: f32[16,1], index: 2, kind: input, shape index: {}]   ;;  %s1165_s3 = inlined_call_operand.vmem [shape: f32[16,32], index: 3, kind: input, shape index: {}]   ;;  %s1166_s4 = inlined_call_operand.vmem [shape: f32[32,256], index: 4, kind: input, shape index: {}]   ;;  %s1167_s5 = inlined_call_operand.vmem [shape: f32[1,128], index: 5, kind: input, shape index: {}]   ;;  %s1168_s6 = inlined_call_operand.vmem [shape: f32[128,2], index: 6, kind: input, shape index: {}]   ;;  %s1169_s7 = inlined_call_operand.vmem [shape: f32[1,2], index: 7, kind: input, shape index: {}]   ;;  %s1170_s8 = inlined_call_operand.vmem [shape: f32[64,32], index: 8, kind: input, shape index: {}]   ;;  %s1171_s9 = inlined_call_operand.vmem [shape: f32[2,32], index: 9, kind: input, shape index: {}]   ;;  %s1172_s10 = inlined_call_operand.vmem [shape: f32[1,2], index: 10, kind: input, shape index: {}]   ;;  %s1173_s11 = inlined_call_operand.hbm [shape: f32[16,32], index: 11, kind: output, shape index: {}]  }
   0x1   :  { %17 = vsyncpa [#allocation11], 0 }
   0x2   :  { %18 = vsyncpa [#allocation8], 0  ;;  %s25_s19 = sshll.u32 %s1162_s0, 4  ;;  %s35_s22 = sshll.u32 %s1163_s1, 4  ;;  %s26_s19 = int_to_ptr.vmem [resolvable:$true] %s25_s19  ;;  %s36_s22 = int_to_ptr.vmem [resolvable:$true] %s35_s22 }
   0x3   :  { %s792_s23 = scalar_lea.vmem %s26_s19, 16  ;;  %p797_p1 = scmp.lt.s32.totalorder %s26_s19, %s26_s19 }
   0x4   :  { %p793_p0 = scmp.ne.s32.totalorder %s26_s19, %s792_s23  ;;  %p798_p2 = scmp.lt.s32.totalorder %s792_s23, %s792_s23 }
   0x6   :  { %p799_p3 = por %p798_p2, %p797_p1 }
   0x8   :  { %p800_p4 = pnand %p799_p3, %p793_p0 }
   0xa   :  { %803 = shalt.err (!%p800_p4)
}
   0xb   :  { %s852_s24 = smov [#allocation7]   ;;  %s804_s25 = scalar_lea.vmem %s36_s22, 16 }
   0xc   :  { %28 = dma.vmem_to_smem %s26_s19, 16, %s852_s24, [#allocation9]  }
   0xd   :  { %p805_p5 = scmp.ne.s32.totalorder %s36_s22, %s804_s25  ;;  %p809_p6 = scmp.lt.s32.totalorder %s36_s22, %s36_s22 }
   0xe   :  { %p810_p7 = scmp.lt.s32.totalorder %s804_s25, %s804_s25 }
  0x10   :  { %p811_p8 = por %p810_p7, %p809_p6 }
  0x12   :  { %p812_p9 = pnand %p811_p8, %p805_p5 }
  0x14   :  { %815 = shalt.err (!%p812_p9)
}
  0x15   :  { %s853_s0 = smov [#allocation10]  }
  0x16   :  { %38 = dma.vmem_to_smem %s36_s22, 16, %s853_s0, [#allocation11]  }
  0x17   :  { %842 = dma.done.wait [#allocation9], 16  }
  0x18   :  { %843 = vsyncadd [#allocation9], 4294967280 }
  0x19   :  { %844 = dma.done.wait [#allocation11], 16  }
  0x1a   :  { %845 = vsyncadd [#allocation11], 4294967280 }
  0x1b   :  { %63 = sfence }
  0x1c   :  { %v64_v0 = vld [vmem:[%s1164_s2] sm:$0xff]  ;;  %v65_v1 = vld [vmem:[%s1164_s2 + $0x8] sm:$0xff]  ;;  %vm182_vm0 = vcmask 523264   ;;  %v80_v5 = vld [vmem:[%s1166_s4 + $0x18] sm:$0xff]  ;;  %v854_v7 = vmov 0.0   ;;  %vm185_vm1 = vcmask 15360   ;;  %v188_v23 = vlaneseq }
  0x1d   :  { %v78_v2 = vld [vmem:[%s1166_s4 + $0x8] sm:$0xff]  ;;  %v66_v3 = vmax.f32 %v64_v0, 1e-30  ;;  %v67_v4 = vmax.f32 %v65_v1, 1e-30  ;;  %v77_v6 = vld [vmem:[%s1166_s4] sm:$0xff]  ;;  %156 = vmatprep.mubr.f32.mxu0 %v854_v7  ;;  %162 = vmatprep.mubr.f32.mxu1 %v854_v7 }
  0x1e   :  { %183 = vst.msk [vmem:[#allocation5] sm:$0xff] %vm182_vm0, %v854_v7  ;;  %184 = vst.msk [vmem:[#allocation5 + $0x8] sm:$0xff] %vm182_vm0, %v854_v7  ;;  %v706_v8 = vpack.c.bf16 %v80_v5, %v78_v2  ;;  %v79_v9 = vld [vmem:[%s1166_s4 + $0x10] sm:$0xff]  ;;  %v82_v10 = vld [vmem:[%s1166_s4 + $0x28] sm:$0xff]  ;;  %vm85_vm2 = vcmask 261120   ;;  %vm72_vm3 = vcmask 7168  }
  0x1f   :  { %v84_v11 = vld [vmem:[%s1166_s4 + $0x38] sm:$0xff]  ;;  %781 = vlog2.f32 %v66_v3  ;;  %v708_v12 = vpack.c.bf16 %v79_v9, %v77_v6  ;;  %v81_v14 = vld [vmem:[%s1166_s4 + $0x20] sm:$0xff]  ;;  %v83_v15 = vld [vmem:[%s1166_s4 + $0x30] sm:$0xff]  ;;  %186 = vst.msk [vmem:[#allocation6] sm:$0xff] %vm185_vm1, %v854_v7  ;;  %v973_v24 = vshrl.u32 %v188_v23, 7 }
  0x20   :  { %v710_v13 = vpack.c.bf16 %v84_v11, %v82_v10  ;;  %187 = vst.msk [vmem:[#allocation6 + $0x8] sm:$0xff] %vm185_vm1, %v854_v7  ;;  %783 = vlog2.f32 %v67_v4  ;;  %707 = vmatprep.subr.bf16.mxu0 %v706_v8  ;;  %754 = vmatprep.subr.bf16.mxu1 %v706_v8  ;;  %v712_v16 = vpack.c.bf16 %v83_v15, %v81_v14  ;;  %v75_v17 = vld [vmem:[%s1165_s3] sm:$0xff]  ;;  %v76_v18 = vld [vmem:[%s1165_s3 + $0x8] sm:$0xff]  ;;  %v993_v28 = vld [vmem:[%s1168_s6 + $0x10] sm:$0xff] }
  0x21   :  { %709 = vmatpush1.bf16.msra.mxu0 %v708_v12  ;;  %756 = vmatpush1.bf16.msra.mxu1 %v708_v12  ;;  %v978_v25 = vld [vmem:[%s1172_s10] ss:$0 sm:$0xff]  ;;  %v988_v27 = vld [vmem:[%s1168_s6 + $0x8] sm:$0xff]  ;;  %v998_v29 = vld [vmem:[%s1168_s6 + $0x18] sm:$0xff] }
  0x22   :  { %711 = vmatprep.subr.bf16.mxu0 %v710_v13  ;;  %755 = vmatprep.subr.bf16.mxu1 %v710_v13  ;;  %v983_v26 = vld [vmem:[%s1168_s6] sm:$0xff]  ;;  %v1008_v31 = vld [vmem:[%s1168_s6 + $0x28] sm:$0xff]  ;;  %v1013_v32 = vld [vmem:[%s1168_s6 + $0x30] sm:$0xff] }
  0x23   :  { %v1003_v30 = vld [vmem:[%s1168_s6 + $0x20] sm:$0xff]  ;;  %v1018_v33 = vld [vmem:[%s1168_s6 + $0x38] sm:$0xff]  ;;  %v1028_v35 = vld [vmem:[%s1168_s6 + $0x48] sm:$0xff] }
  0x24   :  { %v1023_v34 = vld [vmem:[%s1168_s6 + $0x40] sm:$0xff]  ;;  %v1033_v36 = vld [vmem:[%s1168_s6 + $0x50] sm:$0xff]  ;;  %v1038_v37 = vld [vmem:[%s1168_s6 + $0x58] sm:$0xff] }
  0x25   :  { %713 = vmatpush1.bf16.msra.mxu0 %v712_v16  ;;  %757 = vmatpush1.bf16.msra.mxu1 %v712_v16  ;;  %v1043_v38 = vld [vmem:[%s1168_s6 + $0x60] sm:$0xff]  ;;  %v1048_v39 = vld [vmem:[%s1168_s6 + $0x68] sm:$0xff]  ;;  %v1053_v40 = vld [vmem:[%s1168_s6 + $0x70] sm:$0xff] }
  0x26   :  { %v1058_v41 = vld [vmem:[%s1168_s6 + $0x78] sm:$0xff]  ;;  %v1063_v42 = vld [vmem:[%s1169_s7] ss:$0 sm:$0xff]  ;;  %s1068_s6 = smov 0  }
  0x27   :  { %v608_v43 = vld [vmem:[%s1167_s5] ss:$0 sm:$0xff] }
  0x28   :  { %606 = vmatmul.mubr.msk.f32.vlgmr.msra.gmra.mrb[0].mxu0 %vm85_vm2, %v75_v17  ;;  %607 = vmatmul.mubr.msk.f32.vlgmr.msra.gmra.mrb[0].mxu1 %vm85_vm2, %v76_v18 }
  0x29   :  { %v782_v19 = vpop.eup %781 }
  0x2a   :  { %v784_v20 = vpop.eup %783  ;;  %v69_v21 = vmul.f32 0.6931472, %v782_v19 }
  0x2b   :  { %v71_v22 = vmul.f32 0.6931472, %v784_v20 }
  0x2c   :  { %73 = vst.msk [vmem:[#allocation4] sm:$0xff] %vm72_vm3, %v69_v21 }
  0x2d   :  { %74 = vst.msk [vmem:[#allocation4 + $0x8] sm:$0xff] %vm72_vm3, %v71_v22 }
  0xfb   :  { %v158_v44 = vpop.f32.mrb[0].mxu0  ;;  %v164_v45 = vpop.f32.mrb[0].mxu1 }
  0xfc   :  { %v176_v46 = vadd.f32 %v608_v43, %v158_v44  ;;  %v177_v47 = vadd.f32 %v608_v43, %v164_v45  ;;  %v160_v48 = vpop.f32.mrb[1].mxu0  ;;  %v166_v49 = vpop.f32.mrb[1].mxu1 }
  0xfd   :  { %180 = vst [vmem:[#allocation3] sm:$0xff] %v160_v48  ;;  %181 = vst [vmem:[#allocation3 + $0x8] sm:$0xff] %v166_v49 }
  0xfe   :  { %178 = vst [vmem:[#allocation2] sm:$0xff] %v176_v46  ;;  %179 = vst [vmem:[#allocation2 + $0x8] sm:$0xff] %v177_v47 }
  0xff LB: > { %v715_v50 = vpack.c.bf16 %v988_v27, %v983_v26  ;;  %v855_v51 = vmov 0.0|0.0   ;;  %v718_v52 = vpack.c.bf16 %v998_v29, %v993_v28  ;;  %s215_s5 = sld [smem:[#allocation10 + %s850_s6]]  ;;  %vm856_vm4 = vmmov 0   ;;  %s216_s19 = scalar_lea.vmem [#allocation2], %s850_s6  ;;  %s850_s6 = sphi %s1068_s6, %s213_s6  }
 0x100   : > { %714 = vmatprep.subr.bf16.mxu0 %v855_v51  ;;  %v857_v53 = vmov 0.0   ;;  %v858_v54 = vmov 0   ;;  %v721_v55 = vpack.c.bf16 %v1008_v31, %v1003_v30  ;;  %v724_v57 = vpack.c.bf16 %v1018_v33, %v1013_v32  ;;  %s214_s21 = sld [smem:[#allocation7 + %s850_s6]]  ;;  %s388_s22 = scalar_lea.vmem [#allocation6], %s850_s6 }
 0x101   : > { %716 = vmatpush3.bf16.msra.mxu0 %v715_v50  ;;  %679 = vmatprep.mubr.msk.f32.mxu0 %vm856_vm4, %v857_v53  ;;  %v727_v58 = vpack.c.bf16 %v1028_v35, %v1023_v34  ;;  %v730_v59 = vpack.c.bf16 %v1038_v37, %v1033_v36  ;;  %v733_v62 = vpack.c.bf16 %v1048_v39, %v1043_v38  ;;  %v859_v3 = vmov 1   ;;  %s860_s23 = smov 64   ;;  %s861_s24 = smov 96  }
 0x102   : > { %717 = vmatprep.subr.bf16.mxu0 %v855_v51  ;;  %785 = vset.pattern.permute.xlu0 %v858_v54  ;;  %v736_v0 = vpack.c.bf16 %v1058_v41, %v1053_v40  ;;  %vm389_vm7 = vcmask 8192   ;;  %vm367_vm8 = vcmask 1048320   ;;  %vm354_vm9 = vcmask 523520   ;;  %s384_s25 = scalar_lea.vmem [#allocation5], %s850_s6  ;;  %s213_s6 = sadd.s32 1, %s850_s6  }
 0x103   : > { %786 = vset.pattern.permute.xlu1 %v859_v3  ;;  %vm385_vm10 = vcmask 516096   ;;  %p210_p10 = scmp.ge.s32.totalorder %s213_s6, 8  }
 0x104   :  { %vm410_vm11 = vcmask (%p210_p10), 1041408   ;;  %v403_v26 = vld [vmem:[%s1171_s9] sm:$0x3] (%p210_p10)  ;;  %v399_v31 = vld [vmem:[%s1170_s8 + $0x30] sm:$0xff] (%p210_p10)  ;;  %v400_v32 = vld [vmem:[%s1170_s8 + $0x38] sm:$0xff] (%p210_p10) }
 0x105   : > { %719 = vmatpush3.bf16.msra.mxu0 %v718_v52  ;;  %s304_s7 = scalar_lea.vmem [#allocation4], %s215_s5  ;;  %v609_v60 = vld [vmem:[%s216_s19] ss:$0 sm:$0xff]  ;;  %s218_s20 = scalar_lea.vmem [#allocation3], %s215_s5  ;;  %682 = vmatprep.subr.msk.mxu1 (%p210_p10), %vm410_vm11, %v403_v26  ;;  %v750_v33 = vpack.c.bf16 (%p210_p10), %v400_v32, %v399_v31  ;;  %v573_v40 = vld [vmem:[%s1165_s3 + $0x8] sm:$0xff] (%p210_p10) }
 0x106   : > { %720 = vmatprep.subr.bf16.mxu0 %v855_v51  ;;  %v305_v56 = vld [vmem:[%s304_s7] sm:$0xff]  ;;  %v306_v4 = vstv %s214_s21  ;;  %683 = vmatpush3.msk.msra.mxu1 (%p210_p10), %vm410_vm11, %v403_v26  ;;  %s862_s5 = smov (%p210_p10), [#allocation12]  }
 0x107   : > { %326 = vperm.xlu0 %785, %v305_v56   ;;  %v219_v61 = vld [vmem:[%s218_s20] sm:$0xff]  ;;  %vm1093_vm6 = vcmp.lt.s32.totalorder %v973_v24, %v306_v4  ;;  %s583_s7 = sshll.u32 (%p210_p10), %s862_s5, 4  ;;  %s584_s7 = int_to_ptr.vmem [resolvable:$true] %s583_s7 }
 0x108   : > { %v224_v63 = vadd.f32 %v609_v60, %v219_v61  ;;  %v397_v24 = vld [vmem:[%s1170_s8 + $0x20] sm:$0xff] (%p210_p10)  ;;  %s816_s21 = scalar_lea.vmem (%p210_p10), %s584_s7, 256  ;;  %p821_p12 = scmp.lt.s32.totalorder (%p210_p10), %s584_s7, %s584_s7 }
 0x109   : > { %722 = vmatpush3.bf16.msra.mxu0 %v721_v55  ;;  %p817_p11 = scmp.ne.s32.totalorder (%p210_p10), %s584_s7, %s816_s21  ;;  %p822_p13 = scmp.lt.s32.totalorder (%p210_p10), %s816_s21, %s816_s21 }
 0x10a   : > { %723 = vmatprep.subr.bf16.mxu0 %v855_v51  ;;  %v226_v1 = vmul.f32 0.01, %v224_v63  ;;  %vm225_vm5 = vcmp.ge.f32.partialorder %v224_v63, 0.0 }
 0x10b   :  { %p823_p0 = por (%p210_p10), %p822_p13, %p821_p12 }
 0x10c   : > { %v227_v2 = vsel %vm225_vm5, %v224_v63, %v226_v1 }
 0x10d   : > { %725 = vmatpush3.bf16.msra.mxu0 %v724_v57  ;;  %p824_p1 = pnand (%p210_p10), %p823_p0, %p817_p11 }
 0x10e   : > { %726 = vmatprep.subr.bf16.mxu0 %v855_v51 }
 0x111   : > { %728 = vmatpush3.bf16.msra.mxu0 %v727_v58 }
 0x112   : > { %729 = vmatprep.subr.bf16.mxu0 %v855_v51 }
 0x115   : > { %731 = vmatpush3.bf16.msra.mxu0 %v730_v59 }
 0x116   : > { %732 = vmatprep.subr.bf16.mxu0 %v855_v51 }
 0x119   : > { %734 = vmatpush3.bf16.msra.mxu0 %v733_v62 }
 0x11a   : > { %735 = vmatprep.subr.bf16.mxu0 %v855_v51 }
 0x11d   : > { %737 = vmatpush3.bf16.msra.mxu0 %v736_v0 }
 0x120   : > { %680 = vmatmul.mubr.f32.vlgmr.msra.gmra.mrb[0].mxu0 %v227_v2 }
 0x186   : > { %v327_v15 = vpop.permute.xlu0 %326 }
 0x187   : > { %v329_v18 = vmul.f32 %v978_v25, %v327_v15  ;;  %v394_v15 = vld [vmem:[%s1170_s8 + $0x8] sm:$0xff] (%p210_p10) }
 0x188   :  { %v398_v25 = vld [vmem:[%s1170_s8 + $0x28] sm:$0xff] (%p210_p10) }
 0x189   :  { %v746_v30 = vpack.c.bf16 (%p210_p10), %v398_v25, %v397_v24 }
 0x1f3   : > { %v300_v5 = vpop.f32.mrb[0].mxu0 }
 0x1f4   : > { %v301_v7 = vadd.f32 %v1063_v42, %v300_v5  ;;  %v681_v8 = vpop.f32.mrb[1].mxu0 }
 0x1f6   : > { %v310_v9 = vsel %vm1093_vm6, %v301_v7, -1e+30 }
 0x1f7   : > { %v311_v10 = vsel %vm185_vm1, %v310_v9, -inf }
 0x1f8   : > { %v312_v11 = vrot.slane %v311_v10, 4 }
 0x1fa   : > { %v313_v12 = vmax.f32 %v311_v10, %v312_v11 }
 0x1fc   : > { %v314_v13 = vrot.slane %v313_v12, 2 }
 0x1fe   : > { %v315_v14 = vmax.f32 %v313_v12, %v314_v13 }
 0x200   : > { %v316_v16 = vrot.slane %v315_v14, 1 }
 0x202   : > { %v317_v17 = vmax.f32 %v315_v14, %v316_v16  ;;  %v393_v14 = vld [vmem:[%s1170_s8] sm:$0xff] (%p210_p10)  ;;  %v395_v16 = vld [vmem:[%s1170_s8 + $0x10] sm:$0xff] (%p210_p10) }
 0x204   : > { %v330_v19 = vsub.f32 %v301_v7, %v317_v17  ;;  %v738_v17 = vpack.c.bf16 (%p210_p10), %v394_v15, %v393_v14 }
 0x206   : > { %v331_v20 = vadd.f32 %v330_v19, %v329_v18  ;;  %v396_v18 = vld [vmem:[%s1170_s8 + $0x18] sm:$0xff] (%p210_p10)  ;;  %739 = vmatprep.subr.bf16.mxu0 (%p210_p10), %v738_v17 }
 0x207   :  { %v742_v19 = vpack.c.bf16 (%p210_p10), %v396_v18, %v395_v16  ;;  %741 = vmatpush3.bf16.msra.mxu0 (%p210_p10), %v738_v17 }
 0x208   : > { %v332_v21 = vmul.f32 1.442695, %v331_v20  ;;  %v572_v20 = vld [vmem:[%s1165_s3] sm:$0xff] (%p210_p10) }
 0x209   :  { %743 = vmatprep.subr.bf16.mxu0 (%p210_p10), %v742_v19 }
 0x20a   : > { %788 = vpow2.f32 %v332_v21 }
 0x20b   :  { %745 = vmatpush3.bf16.msra.mxu0 (%p210_p10), %v742_v19 }
 0x20c   :  { %747 = vmatprep.subr.bf16.mxu0 (%p210_p10), %v746_v30 }
 0x20f   :  { %749 = vmatpush3.bf16.msra.mxu0 (%p210_p10), %v746_v30 }
 0x210   :  { %751 = vmatprep.subr.bf16.mxu0 (%p210_p10), %v750_v33 }
 0x213   :  { %753 = vmatpush3.bf16.msra.mxu0 (%p210_p10), %v750_v33 }
 0x214   : > { %v789_v22 = vpop.eup %788 }
 0x215   : > { %v334_v23 = vsel %vm1093_vm6, %v789_v22, 0.0 }
 0x216   : > { %v335_v43 = vsel %vm185_vm1, %v334_v23, 0.0 }
 0x217   : > { %v336_v44 = vrot.slane %v335_v43, 4 }
 0x219   : > { %v337_v45 = vadd.f32 %v336_v44, %v335_v43 }
 0x21b   : > { %v338_v46 = vrot.slane %v337_v45, 2 }
 0x21d   : > { %v339_v47 = vadd.f32 %v338_v46, %v337_v45 }
 0x21f   : > { %v340_v48 = vrot.slane %v339_v47, 1 }
 0x221   : > { %v341_v49 = vadd.f32 %v340_v48, %v339_v47 }
 0x223   : > { %v342_v50 = vadd.f32 1e-10, %v341_v49 }
 0x225   : > { %790 = vrcp.f32 %v342_v50 }
 0x22f   : > { %v791_v51 = vpop.eup %790 }
 0x230   : > { %v344_v52 = vmul.f32 %v791_v51, %v342_v50 }
 0x232   : > { %v345_v53 = vsub.f32 2.0, %v344_v52 }
 0x234   : > { %v346_v54 = vmul.f32 %v791_v51, %v345_v53 }
 0x236   : > { %v347_v55 = vmul.f32 %v346_v54, %v334_v23  ;;  %v387_v56 = vmul.f32 %v346_v54, %v341_v49 }
 0x238   : > { %390 = vst.msk [vmem:[%s388_s22] sm:$0x1] %vm389_vm7, %v387_v56  ;;  %363 = vperm.xlu1 %786, %v347_v55   ;;  %350 = vperm.xlu0 %785, %v347_v55  }
 0x23c   : > { %787 = vset.pattern.permute.xlu0 %v859_v3 }
 0x23f   :  { %v401_v27 = vld [vmem:[#allocation6] sm:$0xff] (%p210_p10)  ;;  %v402_v28 = vld [vmem:[#allocation6 + $0x8] sm:$0xff] (%p210_p10) }
 0x240   :  { %684 = vmatprep.mubr.msk.f32.mxu1 (%p210_p10), %vm185_vm1, %v401_v27 }
 0x241   :  { %685 = vmatmul.mubr.msk.f32.vlgmr.msra.gmra.mrb[0].mxu1 (%p210_p10), %vm185_vm1, %v402_v28 }
 0x2b7   : > { %v364_v57 = vpop.permute.xlu1 %363  ;;  %v351_v58 = vpop.permute.xlu0 %350 }
 0x2b8   : > { %v366_v59 = vmul.f32 %v364_v57, %v227_v2  ;;  %v353_v60 = vmul.f32 %v351_v58, %v227_v2 }
 0x2ba   : > { %v368_v61 = vsel %vm367_vm8, %v366_v59, 0.0  ;;  %v355_v62 = vsel %vm354_vm9, %v353_v60, 0.0 }
 0x2bb   : > { %v369_v63 = vrot.slane %v368_v61, 4  ;;  %v356_v0 = vrot.slane %v355_v62, 4 }
 0x2bd   : > { %v370_v1 = vadd.f32 %v369_v63, %v368_v61  ;;  %v357_v4 = vadd.f32 %v356_v0, %v355_v62 }
 0x2bf   : > { %v371_v5 = vrot.slane %v370_v1, 2  ;;  %v358_v6 = vrot.slane %v357_v4, 2 }
 0x2c1   : > { %v372_v7 = vadd.f32 %v371_v5, %v370_v1  ;;  %v359_v8 = vadd.f32 %v358_v6, %v357_v4 }
 0x2c3   : > { %v373_v9 = vrot.slane %v372_v7, 1  ;;  %v360_v10 = vrot.slane %v359_v8, 1 }
 0x2c5   : > { %v374_v3 = vadd.f32 %v373_v9, %v372_v7  ;;  %v361_v11 = vadd.f32 %v360_v10, %v359_v8 }
 0x2c7   : > { %380 = vrot.lane.b32.xlu0 %v374_v3, %s860_s23  ;;  %376 = vrot.lane.b32.xlu1 %v361_v11, %s861_s24 }
 0x314   :  { %v686_v35 = vpop.f32.mrb[0].mxu1 (%p210_p10) }
 0x315   :  { %v480_v36 = vpop.f32.mrb[1].mxu1 (%p210_p10) }
 0x335   :  { %212 = sbr.rel (!%p210_p10) target bundleno = 255 (0xff), region = 84 }
 0x339   : > { %v377_v2 = vpop.permute.xlu1 %376  ;;  %v381_v12 = vpop.permute.xlu0 %380 }
 0x33a   : > { %v383_v13 = vsel %vm85_vm2, %v377_v2, %v381_v12 }
 0x33b   : > { %386 = vst.msk [vmem:[%s384_s25] sm:$0x1] %vm385_vm10, %v383_v13 }
 0x342   :  { %v391_v29 = vld [vmem:[#allocation5] sm:$0xff]  ;;  %v392_v34 = vld [vmem:[#allocation5 + $0x8] sm:$0xff] }
 0x343   :  { %703 = vmatprep.mubr.msk.f32.mxu0 %vm182_vm0, %v391_v29 }
 0x344   :  { %704 = vmatmul.mubr.msk.f32.vlgmr.msra.gmra.mrb[0].mxu0 %vm182_vm0, %v392_v34 }
 0x417   :  { %v705_v37 = vpop.f32.mrb[0].mxu0 }
 0x418   :  { %v567_v38 = vadd.f32 %v705_v37, %v686_v35  ;;  %v561_v39 = vpop.f32.mrb[1].mxu0 }
 0x419   :  { %v562_v41 = vadd.f32 %v561_v39, %v480_v36 }
 0x41a   :  { %v571_v42 = vmul.f32 0.5, %v567_v38 }
 0x41b   :  { %v570_v21 = vmul.f32 0.5, %v562_v41 }
 0x41c   :  { %v575_v22 = vadd.f32 %v573_v40, %v571_v42 }
 0x41d   :  { %v574_v23 = vadd.f32 %v572_v20, %v570_v21 }
 0x41e   :  { %577 = vst.msk [vmem:[#allocation12 + $0x8] sm:$0xff] %vm85_vm2, %v575_v22 }
 0x41f   :  { %576 = vst.msk [vmem:[#allocation12] sm:$0xff] %vm85_vm2, %v574_v23 }
 0x420   :  { %827 = shalt.err (!%p824_p1)
}
 0x421   :  { %s828_s24 = scalar_lea.hbm %s1173_s11, 256 }
 0x422   :  { %p829_p2 = scmp.ne.s32.totalorder %s1173_s11, %s828_s24  ;;  %p832_p3 = scmp.lt.u32.totalorder %s828_s24, %s1173_s11 }
 0x424   :  { %p834_p4 = pnand %p832_p3, %p829_p2 }
 0x426   :  { %837 = shalt.err (!%p834_p4)
}
 0x427   :  { %s863_s1 = smov 128   ;;  %s864_s26 = smov 8  }
 0x428   :  { %589 = dma.vmem_to_hbm [thread:$0]  %s584_s7, 256, %s1173_s11, [#allocation8], %s863_s1, %s863_s1, %s864_s26  }
 0x429   :  { %846 = dma.done.wait [#allocation8], 256  }
 0x42a   :  { %847 = vsyncadd [#allocation8], 4294967040 }
 0x42b   :  { %593 = vsyncpa [#allocation8], 1 }
 0x42c   :  { %594 = vsyncpa [#allocation9], 1 }
 0x42d   :  { %595 = vsyncpa [#allocation11], 1 }

</bundles_post_ra>
